<compile_context>
chip_gen: v5e
topology: v5e:2x2
jax: 0.10.0
libtpu: 0.0.40
codegen_flags: <defaults>
</compile_context>

<pallas_src>
import jax
import jax.numpy as jnp
from jax.experimental import pallas as pl
from jax.experimental.pallas import tpu as pltpu


_LANE = 128            # full vreg lane width -> unmasked stores
_MAX_BLOCK_ROWS = 4096  # 4096 x 128 f32 = 2 MiB per block


# ----------------------------- kernel -------------------------------------- #

def _crelu_kernel(re_ref, im_ref, re_out_ref, im_out_ref):
    # Pure VPU elementwise max; mem-bound.
    re_out_ref[...] = jnp.maximum(re_ref[...], 0)
    im_out_ref[...] = jnp.maximum(im_ref[...], 0)


# ----------------------------- wrapper -------------------------------------- #

def _ceil_div(a, b):
    return -(-a // b)


def crelu(x):
    """CRELU: relu(x.real) + 1j*relu(x.imag). x: complex array, any shape."""
    assert jnp.issubdtype(x.dtype, jnp.complexfloating), "CRELU expects complex input"

    # TODO(synk): complex<->(real,imag) split/recombine has no Pallas equivalent
    # (TPU refs are real-typed only); it stays in the XLA wrapper.
    re = jnp.real(x)
    im = jnp.imag(x)
    orig_shape = x.shape
    fdtype = re.dtype
    total = re.size

    # Lane-dense 2D layout: (rows, 128).
    rows = _ceil_div(total, _LANE)
    if rows <= _MAX_BLOCK_ROWS:
        block_rows = rows            # single block == full rows dim (allowed)
        padded_rows = rows
    else:
        block_rows = _MAX_BLOCK_ROWS
        padded_rows = _ceil_div(rows, block_rows) * block_rows
    padded_total = padded_rows * _LANE

    def to2d(a):
        a = a.reshape(-1)
        if padded_total != total:
            a = jnp.pad(a, (0, padded_total - total))
        return a.reshape(padded_rows, _LANE)

    re2 = to2d(re)
    im2 = to2d(im)

    grid = (padded_rows // block_rows,)
    spec = pl.BlockSpec((block_rows, _LANE), lambda i: (i, 0))

    re_o, im_o = pl.pallas_call(
        _crelu_kernel,
        out_shape=(
            jax.ShapeDtypeStruct((padded_rows, _LANE), fdtype),
            jax.ShapeDtypeStruct((padded_rows, _LANE), fdtype),
        ),
        grid_spec=pltpu.PrefetchScalarGridSpec(
            num_scalar_prefetch=0,
            grid=grid,
            in_specs=[spec, spec],
            out_specs=[spec, spec],
        ),
        compiler_params=pltpu.CompilerParams(
            dimension_semantics=("parallel",),
            vmem_limit_bytes=64 << 20,
        ),
    )(re2, im2)

    def from2d(a):
        a = a.reshape(-1)
        if padded_total != total:
            a = a[:total]
        return a.reshape(orig_shape)

    return jax.lax.complex(from2d(re_o), from2d(im_o))


# ---------------------------- pure-JAX ref ---------------------------------- #

def _crelu_ref(x):
    return jnp.maximum(jnp.real(x), 0) + 1j * jnp.maximum(jnp.imag(x), 0)


# ------------------------------- main --------------------------------------- #

if __name__ == "__main__":
    key = jax.random.PRNGKey(0)
    k1, k2, k3, k4 = jax.random.split(key, 4)

    # Small shape consistent with the module: batch=2, seq=8, hidden=32, complex64.
    B, T, C = 2, 8, 32
    re = jax.random.normal(k1, (B, T, C), dtype=jnp.float32)
    im = jax.random.normal(k2, (B, T, C), dtype=jnp.float32)
    x = jax.lax.complex(re, im)                      # complex64

    y = crelu(x)
    jax.block_until_ready(y)

    y_ref = _crelu_ref(x)
    assert y.dtype == x.dtype
    assert y.shape == x.shape
    assert jnp.allclose(jnp.real(y), jnp.maximum(re, 0), atol=0, rtol=0)
    assert jnp.allclose(jnp.imag(y), jnp.maximum(im, 0), atol=0, rtol=0)
    assert jnp.allclose(y, y_ref)

    # Larger, ragged shape: exercises padding + multi-block grid tiling.
    B2, T2, C2 = 3, 1111, 200
    re2 = jax.random.normal(k3, (B2, T2, C2), dtype=jnp.float32)
    im2 = jax.random.normal(k4, (B2, T2, C2), dtype=jnp.float32)
    x2 = jax.lax.complex(re2, im2)

    y2 = crelu(x2)
    jax.block_until_ready(y2)
    assert jnp.allclose(y2, _crelu_ref(x2))

    print("KERNEL_OK")
</pallas_src>

<mosaic_0001>
module attributes {stable_mosaic.version = 11 : i64} {
  func.func @_crelu_kernel(%arg0: i32, %arg1: memref<4x128xf32, #tpu.memory_space<vmem>>, %arg2: memref<4x128xf32, #tpu.memory_space<vmem>>, %arg3: memref<4x128xf32, #tpu.memory_space<vmem>>, %arg4: memref<4x128xf32, #tpu.memory_space<vmem>>) attributes {dimension_semantics = [#tpu.dimension_semantics<parallel>], iteration_bounds = array<i64: 1>, scalar_prefetch = 0 : i64, scratch_operands = 0 : i64, tpu.core_type = #tpu.core_type<tc>, window_params = [{transform_indices = @transform_0, window_bounds = array<i64: 4, 128>}, {transform_indices = @transform_1, window_bounds = array<i64: 4, 128>}, {transform_indices = @transform_2, window_bounds = array<i64: 4, 128>}, {transform_indices = @transform_3, window_bounds = array<i64: 4, 128>}]} {
    %c0 = arith.constant 0 : index
    %c0_0 = arith.constant 0 : index
    %0 = vector.load %arg1[%c0, %c0_0] : memref<4x128xf32, #tpu.memory_space<vmem>>, vector<4x128xf32>
    %cst = arith.constant 0.000000e+00 : f32
    %1 = vector.broadcast %cst : f32 to vector<4x128xf32>
    %2 = arith.maximumf %0, %1 : vector<4x128xf32>
    %c0_1 = arith.constant 0 : index
    %c0_2 = arith.constant 0 : index
    %3 = vector.load %arg3[%c0_1, %c0_2] : memref<4x128xf32, #tpu.memory_space<vmem>>, vector<4x128xf32>
    tpu.vector_store %arg3[%c0_1, %c0_2], %2 {strides = array<i32>} : memref<4x128xf32, #tpu.memory_space<vmem>>, vector<4x128xf32>,
    %c0_3 = arith.constant 0 : index
    %c0_4 = arith.constant 0 : index
    %4 = vector.load %arg2[%c0_3, %c0_4] : memref<4x128xf32, #tpu.memory_space<vmem>>, vector<4x128xf32>
    %cst_5 = arith.constant 0.000000e+00 : f32
    %5 = vector.broadcast %cst_5 : f32 to vector<4x128xf32>
    %6 = arith.maximumf %4, %5 : vector<4x128xf32>
    %c0_6 = arith.constant 0 : index
    %c0_7 = arith.constant 0 : index
    %7 = vector.load %arg4[%c0_6, %c0_7] : memref<4x128xf32, #tpu.memory_space<vmem>>, vector<4x128xf32>
    tpu.vector_store %arg4[%c0_6, %c0_7], %6 {strides = array<i32>} : memref<4x128xf32, #tpu.memory_space<vmem>>, vector<4x128xf32>,
    return
  }
  func.func @transform_0(%arg0: i32) -> (i32, i32) {
    %c0_i32 = arith.constant 0 : i32
    %c0_i32_0 = arith.constant 0 : i32
    return %arg0, %c0_i32 : i32, i32
  }
  func.func @transform_1(%arg0: i32) -> (i32, i32) {
    %c0_i32 = arith.constant 0 : i32
    %c0_i32_0 = arith.constant 0 : i32
    return %arg0, %c0_i32 : i32, i32
  }
  func.func @transform_2(%arg0: i32) -> (i32, i32) {
    %c0_i32 = arith.constant 0 : i32
    %c0_i32_0 = arith.constant 0 : i32
    return %arg0, %c0_i32 : i32, i32
  }
  func.func @transform_3(%arg0: i32) -> (i32, i32) {
    %c0_i32 = arith.constant 0 : i32
    %c0_i32_0 = arith.constant 0 : i32
    return %arg0, %c0_i32 : i32, i32
  }
}

</mosaic_0001>

<bundles_post_ra>
// kernel: tpu_custom_call.1
= control target key start
LH: loop header
LB: loop body
LE: loop exit
PB: predicated region body
PF: predicated region fallthrough
CT: control target
= control target key end

     0   :  { %9 = vsyncpa [#allocation3], 0  ;;  %s227_s0 = inlined_call_operand.hbm [shape: f32[4,128], index: 0, kind: input, shape index: {}]   ;;  %s228_s1 = inlined_call_operand.hbm [shape: f32[4,128], index: 1, kind: input, shape index: {}]   ;;  %s229_s2 = inlined_call_operand.hbm [shape: f32[4,128], index: 2, kind: output, shape index: {0}]   ;;  %s230_s3 = inlined_call_operand.hbm [shape: f32[4,128], index: 3, kind: output, shape index: {1}]  }
   0x1   :  { %10 = vsyncpa [#allocation6], 0 }
   0x2   :  { %11 = vsyncpa [#allocation4], 0 }
   0x3   :  { %12 = vsyncpa [#allocation9], 0  ;;  %s18_s14 = sshll.u32 %s227_s0, 4  ;;  %s191_s15 = smov [#allocation2]   ;;  %s19_s14 = int_to_ptr.hbm [resolvable:$true] %s18_s14 }
   0x4   :  { %s20_s16 = sshll.u32 %s191_s15, 4  ;;  %s29_s19 = sshll.u32 %s228_s1, 4  ;;  %s21_s16 = int_to_ptr.vmem [resolvable:$true] %s20_s16  ;;  %s30_s19 = int_to_ptr.hbm [resolvable:$true] %s29_s19 }
   0x5   :  { %23 = dma.hbm_to_vmem [thread:$0]  %s19_s14, 64, %s21_s16, [#allocation3]  }
   0x6   :  { %s192_s20 = smov [#allocation5]  }
   0x7   :  { %s31_s21 = sshll.u32 %s192_s20, 4  ;;  %s32_s21 = int_to_ptr.vmem [resolvable:$true] %s31_s21 }
   0x8   :  { %34 = dma.hbm_to_vmem [thread:$0]  %s30_s19, 64, %s32_s21, [#allocation6]  }
   0x9   :  { %183 = dma.done.wait [#allocation3], 64  }
   0xa   :  { %184 = vsyncadd [#allocation3], 4294967232 }
   0xb   :  { %185 = dma.done.wait [#allocation6], 64  }
   0xc   :  { %186 = vsyncadd [#allocation6], 4294967232  ;;  %s193_s22 = smov [#allocation7]   ;;  %s56_s25 = sshll.u32 %s229_s2, 4  ;;  %v43_v0 = vld [vmem:[#allocation2] sm:$0xf]  ;;  %s57_s25 = int_to_ptr.hbm [resolvable:$true] %s56_s25 }
   0xd   :  { %s54_s0 = sshll.u32 %s193_s22, 4  ;;  %s194_s26 = smov [#allocation8]   ;;  %v46_v1 = vld [vmem:[#allocation5] sm:$0xf]  ;;  %v44_v2 = vmax.f32 %v43_v0, 0.0  ;;  %s55_s0 = int_to_ptr.vmem [resolvable:$true] %s54_s0 }
   0xe   :  { %s65_s27 = sshll.u32 %s194_s26, 4  ;;  %s67_s29 = sshll.u32 %s230_s3, 4  ;;  %v47_v3 = vmax.f32 %v46_v1, 0.0  ;;  %s66_s27 = int_to_ptr.vmem [resolvable:$true] %s65_s27  ;;  %s68_s29 = int_to_ptr.hbm [resolvable:$true] %s67_s29 }
   0xf   :  { %45 = vst [vmem:[#allocation7] sm:$0xf] %v44_v2 }
  0x10   :  { %48 = vst [vmem:[#allocation8] sm:$0xf] %v47_v3  ;;  %59 = dma.vmem_to_hbm [thread:$0]  %s55_s0, 64, %s57_s25, [#allocation4]  }
  0x11   :  { %70 = dma.vmem_to_hbm [thread:$0]  %s66_s27, 64, %s68_s29, [#allocation9]  }
  0x12   :  { %187 = dma.done.wait [#allocation4], 64  }
  0x13   :  { %188 = vsyncadd [#allocation4], 4294967232 }
  0x14   :  { %189 = dma.done.wait [#allocation9], 64  }
  0x15   :  { %190 = vsyncadd [#allocation9], 4294967232 }
  0x16   :  { %79 = vsyncpa [#allocation3], 1 }
  0x17   :  { %80 = vsyncpa [#allocation6], 1 }
  0x18   :  { %81 = vsyncpa [#allocation4], 1 }
  0x19   :  { %82 = vsyncpa [#allocation9], 1 }

</bundles_post_ra>
